<compile_context>
chip_gen: v6e
topology: v6e:2x2x1
jax: 0.10.0
libtpu: 0.0.40
codegen_flags: <defaults>
</compile_context>

<pallas_src>
import functools

import jax
import jax.numpy as jnp
from jax import lax
from jax.experimental import pallas as pl
from jax.experimental.pallas import tpu as pltpu

_EPS = 1e-5
_MOMENTUM = 0.1


# ---------------------------------------------------------------------------
# Hardware-gated budgets
# ---------------------------------------------------------------------------
def _hw_budgets():
    """Return (vmem_limit_bytes, max_block_bytes), gated per TPU generation."""
    cap = None
    try:
        cap = getattr(pltpu.get_tpu_info(), "vmem_capacity_bytes", None)
    except Exception:
        cap = None
    if cap is None:
        cap = 64 << 20                      # conservative (v7x per-TC VMEM)
    if cap >= (96 << 20):                   # v5e / v6e / v5p: 128 MiB VMEM
        return 96 << 20, 12 << 20
    return 48 << 20, 6 << 20                # v7x: 64 MiB VMEM per TensorCore


# ---------------------------------------------------------------------------
# Pallas kernels
# ---------------------------------------------------------------------------
def _train_bn_kernel(x_ref, gamma_ref, beta_ref, o_ref, mean_ref, var_ref):
    """One (split, channel-tile) block holding ALL rows of that split.

    x_ref: (n, tc); gamma_ref/beta_ref: (1, tc); outputs: y (n, tc),
    batch mean/var (1, tc) in f32 (for running-stat updates in the wrapper).
    """
    xf = x_ref[...].astype(jnp.float32)                           # (n, tc)
    inv_n = 1.0 / float(xf.shape[0])
    mean = jnp.sum(xf, axis=0, keepdims=True) * inv_n             # (1, tc)
    centered = xf - mean                                          # two-pass: robust var
    var = jnp.sum(centered * centered, axis=0, keepdims=True) * inv_n
    # Fold per-channel constants: elementwise path is a single FMA-shaped op.
    scale = lax.rsqrt(var + _EPS) * gamma_ref[...].astype(jnp.float32)
    o_ref[...] = (centered * scale + beta_ref[...].astype(jnp.float32)).astype(o_ref.dtype)
    mean_ref[...] = mean
    var_ref[...] = var


def _affine_kernel(x_ref, scale_ref, shift_ref, o_ref):
    """Per-channel affine y = x*scale + shift. x_ref: (tr, tc); scale/shift: (1, tc)."""
    xf = x_ref[...].astype(jnp.float32)
    o_ref[...] = (xf * scale_ref[...].astype(jnp.float32)
                  + shift_ref[...].astype(jnp.float32)).astype(o_ref.dtype)


def _stats_kernel(n_total, x_ref, mean_ref, var_ref, s1_acc, s2_acc):
    """Row-tiled fallback stats: accumulate sums over row tiles (last grid axis)."""
    r = pl.program_id(2)

    @pl.when(r == 0)
    def _init():
        s1_acc[...] = jnp.zeros_like(s1_acc)
        s2_acc[...] = jnp.zeros_like(s2_acc)

    xf = x_ref[...].astype(jnp.float32)                           # (tr, tc)
    s1_acc[...] += jnp.sum(xf, axis=0, keepdims=True)
    s2_acc[...] += jnp.sum(xf * xf, axis=0, keepdims=True)

    @pl.when(r == pl.num_programs(2) - 1)
    def _finalize():
        inv_n = 1.0 / float(n_total)
        mean = s1_acc[...] * inv_n
        mean_ref[...] = mean
        var_ref[...] = jnp.maximum(s2_acc[...] * inv_n - mean * mean, 0.0)


# ---------------------------------------------------------------------------
# Tiling helpers
# ---------------------------------------------------------------------------
def _choose_lane_tile(C, rows, max_block_bytes, min_tiles=1):
    """Lane tile: multiple of 128 dividing C (or C itself when C % 128 != 0).

    Prefers tc == C (one fat contiguous DMA per block) whenever it fits the
    per-block byte budget.  min_tiles=2 caps tc below C (when a legal smaller
    divisor exists) so a short grid still has >=2 steps for v7x megacore.
    """
    if C % 128 != 0:
        # TODO(synk): lane-padding to a multiple of 128 (masked vst avoidance)
        # is skipped -- production reid channel counts are multiples of 128.
        return C
    bytes_per_row = 4 * max(int(rows), 1)          # budget in f32 (covers upcast temps)
    cap_budget = max(128, (max_block_bytes // bytes_per_row) // 128 * 128)
    cap_tiles = C if min_tiles <= 1 else max(128, (C // min_tiles) // 128 * 128)
    cap = min(cap_budget, cap_tiles, C)
    for cand in range(cap, 127, -128):
        if C % cand == 0:
            return cand
    return 128


def _choose_row_tile(n, tc, max_block_bytes):
    """Largest multiple of 8 dividing n with tr*tc*4 <= budget; n if impossible."""
    if n % 8 != 0:
        return n
    cap = max(8, (max_block_bytes // (4 * tc)) // 8 * 8)
    for cand in range(min(cap, n), 7, -8):
        if n % cand == 0:
            return cand
    return n


# ---------------------------------------------------------------------------
# Pallas wrappers
# ---------------------------------------------------------------------------
def _train_bn_single(x_splits, gammas, betas, tc, vmem_limit):
    """Fast path: one block holds all rows of a split. x_splits: (2, n, C)."""
    S, n, C = x_splits.shape
    grid = (S, C // tc)
    out_shape = (
        jax.ShapeDtypeStruct((S, n, C), x_splits.dtype),
        jax.ShapeDtypeStruct((S, 1, C), jnp.float32),
        jax.ShapeDtypeStruct((S, 1, C), jnp.float32),
    )
    return pl.pallas_call(
        _train_bn_kernel,
        out_shape=out_shape,
        grid_spec=pltpu.PrefetchScalarGridSpec(
            num_scalar_prefetch=0,
            grid=grid,
            in_specs=[
                pl.BlockSpec((None, n, tc), lambda s, j: (s, 0, j)),
                pl.BlockSpec((None, 1, tc), lambda s, j: (s, 0, j)),
                pl.BlockSpec((None, 1, tc), lambda s, j: (s, 0, j)),
            ],
            out_specs=[
                pl.BlockSpec((None, n, tc), lambda s, j: (s, 0, j)),
                pl.BlockSpec((None, 1, tc), lambda s, j: (s, 0, j)),
                pl.BlockSpec((None, 1, tc), lambda s, j: (s, 0, j)),
            ],
        ),
        compiler_params=pltpu.CompilerParams(
            dimension_semantics=("parallel", "parallel"),
            vmem_limit_bytes=vmem_limit,
        ),
    )(x_splits, gammas, betas)


def _train_bn_tiled(x_splits, gammas, betas, tc, tr, vmem_limit):
    """Fallback for very large per-split batches: row-tiled stats + affine passes."""
    S, n, C = x_splits.shape
    nct, nrt = C // tc, n // tr

    mean, var = pl.pallas_call(
        functools.partial(_stats_kernel, n),
        out_shape=(jax.ShapeDtypeStruct((S, 1, C), jnp.float32),
                   jax.ShapeDtypeStruct((S, 1, C), jnp.float32)),
        grid_spec=pltpu.PrefetchScalarGridSpec(
            num_scalar_prefetch=0,
            grid=(S, nct, nrt),
            in_specs=[pl.BlockSpec((None, tr, tc), lambda s, j, r: (s, r, j))],
            out_specs=[pl.BlockSpec((None, 1, tc), lambda s, j, r: (s, 0, j)),
                       pl.BlockSpec((None, 1, tc), lambda s, j, r: (s, 0, j))],
            scratch_shapes=[pltpu.VMEM((1, tc), jnp.float32),
                            pltpu.VMEM((1, tc), jnp.float32)],
        ),
        compiler_params=pltpu.CompilerParams(
            dimension_semantics=("parallel", "parallel", "arbitrary"),
            vmem_limit_bytes=vmem_limit,
        ),
    )(x_splits)

    # Fold per-channel constants once (O(C), negligible), then 2-op normalize.
    scale = gammas.astype(jnp.float32) * lax.rsqrt(var + _EPS)        # (S, 1, C)
    shift = betas.astype(jnp.float32) - mean * scale                  # (S, 1, C)

    y = pl.pallas_call(
        _affine_kernel,
        out_shape=jax.ShapeDtypeStruct((S, n, C), x_splits.dtype),
        grid_spec=pltpu.PrefetchScalarGridSpec(
            num_scalar_prefetch=0,
            grid=(S, nct, nrt),
            in_specs=[pl.BlockSpec((None, tr, tc), lambda s, j, r: (s, r, j)),
                      pl.BlockSpec((None, 1, tc), lambda s, j, r: (s, 0, j)),
                      pl.BlockSpec((None, 1, tc), lambda s, j, r: (s, 0, j))],
            out_specs=pl.BlockSpec((None, tr, tc), lambda s, j, r: (s, r, j)),
        ),
        compiler_params=pltpu.CompilerParams(
            dimension_semantics=("parallel", "parallel", "parallel"),
            vmem_limit_bytes=vmem_limit,
        ),
    )(x_splits, scale, shift)
    return y, mean, var


def _eval_bn(x, scale, shift, max_block_bytes, vmem_limit):
    """Eval-mode BN_T: tiled per-channel affine over the native (B, C) layout."""
    B, C = x.shape
    # >= 2 lane-dense channel tiles so both v7x TensorCores get work (near-free
    # on single-core chips: one extra grid step).
    tc = _choose_lane_tile(C, B, max_block_bytes, min_tiles=2)
    tr = B if B * tc * 4 <= max_block_bytes else _choose_row_tile(B, tc, max_block_bytes)
    grid = (B // tr, C // tc)
    return pl.pallas_call(
        _affine_kernel,
        out_shape=jax.ShapeDtypeStruct((B, C), x.dtype),
        grid_spec=pltpu.PrefetchScalarGridSpec(
            num_scalar_prefetch=0,
            grid=grid,
            in_specs=[
                pl.BlockSpec((tr, tc), lambda r, j: (r, j)),
                pl.BlockSpec((1, tc), lambda r, j: (0, j)),
                pl.BlockSpec((1, tc), lambda r, j: (0, j)),
            ],
            out_specs=pl.BlockSpec((tr, tc), lambda r, j: (r, j)),
        ),
        compiler_params=pltpu.CompilerParams(
            dimension_semantics=("parallel", "parallel"),
            vmem_limit_bytes=vmem_limit,
        ),
    )(x, scale, shift)


# ---------------------------------------------------------------------------
# Module
# ---------------------------------------------------------------------------
class DSBN1d:
    """JAX/Pallas port of reid.models.dsbn_idm.DSBN1d (forward pass)."""

    def __init__(self, planes, key=None, momentum=_MOMENTUM):
        self.num_features = planes
        self.momentum = momentum
        if key is None:
            key = jax.random.PRNGKey(0)
        ks = jax.random.split(key, 4)

        # PyTorch default is weight=1, bias=0; perturb so the affine path is
        # actually exercised in the correctness check.
        def w(k):
            return 1.0 + 0.1 * jax.random.normal(k, (planes,), jnp.float32)

        def b(k):
            return 0.1 * jax.random.normal(k, (planes,), jnp.float32)

        self.w_S, self.b_S = w(ks[0]), b(ks[1])    # BN_S
        self.w_T, self.b_T = w(ks[2]), b(ks[3])    # BN_T
        # Running stats (PyTorch defaults); eval-mode forward uses BN_T stats.
        self.rm_S = jnp.zeros((planes,), jnp.float32)
        self.rv_S = jnp.ones((planes,), jnp.float32)
        self.rm_T = jnp.zeros((planes,), jnp.float32)
        self.rv_T = jnp.ones((planes,), jnp.float32)
        self._max_block_override = None            # test hook / manual tuning

    def _budgets(self):
        vmem_limit, max_block = _hw_budgets()
        if self._max_block_override is not None:
            max_block = int(self._max_block_override)
        return vmem_limit, max_block

    def __call__(self, x, training=True):
        # TODO(synk): (N, C, L) BatchNorm1d inputs are not handled (reid usage is (N, C)).
        B, C = x.shape
        assert C == self.num_features
        vmem_limit, max_block = self._budgets()

        if not training:
            inv = lax.rsqrt(self.rv_T + _EPS)
            scale = (self.w_T * inv).reshape(1, C)
            shift = (self.b_T - self.rm_T * self.w_T * inv).reshape(1, C)
            return _eval_bn(x, scale, shift, max_block, vmem_limit)

        assert B % 2 == 0, "batch size must be even in training mode"
        n = B // 2
        xs = x.reshape(2, n, C)                                   # free view, no transpose
        gammas = jnp.stack([self.w_S, self.w_T]).reshape(2, 1, C)
        betas = jnp.stack([self.b_S, self.b_T]).reshape(2, 1, C)

        tc = _choose_lane_tile(C, n, max_block)
        if n * tc * 4 <= max_block:
            ys, bmean, bvar = _train_bn_single(xs, gammas, betas, tc, vmem_limit)
        else:
            tr = _choose_row_tile(n, tc, max_block)
            if tr >= n:  # rows cannot be tiled legally; accept the big block
                ys, bmean, bvar = _train_bn_single(xs, gammas, betas, tc, vmem_limit)
            else:
                ys, bmean, bvar = _train_bn_tiled(xs, gammas, betas, tc, tr, vmem_limit)

        # PyTorch-style running-stat momentum updates (running_var is unbiased).
        m = self.momentum
        ub = float(n) / float(n - 1) if n > 1 else 1.0
        bmean = bmean.reshape(2, C)
        bvar = bvar.reshape(2, C)
        self.rm_S = (1.0 - m) * self.rm_S + m * bmean[0]
        self.rv_S = (1.0 - m) * self.rv_S + m * bvar[0] * ub
        self.rm_T = (1.0 - m) * self.rm_T + m * bmean[1]
        self.rv_T = (1.0 - m) * self.rv_T + m * bvar[1] * ub
        return ys.reshape(B, C)


# ---------------------------------------------------------------------------
# Pure-JAX reference (for correctness check)
# ---------------------------------------------------------------------------
def _ref_bn_train(x, gamma, beta):
    mean = x.mean(axis=0, keepdims=True)
    var = ((x - mean) ** 2).mean(axis=0, keepdims=True)
    return (x - mean) * lax.rsqrt(var + _EPS) * gamma[None, :] + beta[None, :]


def _ref_forward_train(mod, x):
    n = x.shape[0] // 2
    o1 = _ref_bn_train(x[:n], mod.w_S, mod.b_S)
    o2 = _ref_bn_train(x[n:], mod.w_T, mod.b_T)
    return jnp.concatenate([o1, o2], axis=0)


def _ref_forward_eval(mod, x):
    inv = lax.rsqrt(mod.rv_T + _EPS)
    return (x - mod.rm_T[None, :]) * (mod.w_T * inv)[None, :] + mod.b_T[None, :]


if __name__ == "__main__":
    key = jax.random.PRNGKey(0)
    k_p1, k_x1, k_p2, k_x2, k_p3, k_x3 = jax.random.split(key, 6)

    # --- Main test: lane-dense channels, single-block fast path -------------
    B, C = 8, 256
    x = jax.random.normal(k_x1, (B, C), jnp.float32)
    mod = DSBN1d(C, k_p1)

    out = jax.block_until_ready(mod(x, training=True))
    ref = _ref_forward_train(mod, x)
    assert out.shape == (B, C)
    assert jnp.allclose(out, ref, atol=1e-4, rtol=1e-4), "train mismatch vs reference"

    # Running-stat momentum update check (BN_T half of the batch).
    n = B // 2
    ref_rm_T = 0.9 * jnp.zeros((C,)) + 0.1 * x[n:].mean(axis=0)
    ref_rv_T = 0.9 * jnp.ones((C,)) + 0.1 * x[n:].var(axis=0, ddof=1)
    assert jnp.allclose(mod.rm_T, ref_rm_T, atol=1e-4, rtol=1e-4), "running_mean mismatch"
    assert jnp.allclose(mod.rv_T, ref_rv_T, atol=1e-4, rtol=1e-4), "running_var mismatch"

    out_eval = jax.block_until_ready(mod(x, training=False))
    ref_eval = _ref_forward_eval(mod, x)
    assert jnp.allclose(out_eval, ref_eval, atol=1e-4, rtol=1e-4), "eval mismatch vs reference"

    # --- Secondary test: channel count not a multiple of 128 ----------------
    B2, C2 = 6, 20
    x2 = jax.random.normal(k_x2, (B2, C2), jnp.float32)
    mod2 = DSBN1d(C2, k_p2)
    out2 = jax.block_until_ready(mod2(x2, training=True))
    ref2 = _ref_forward_train(mod2, x2)
    assert out2.shape == (B2, C2)
    assert jnp.allclose(out2, ref2, atol=1e-4, rtol=1e-4), "small-C train mismatch"
    out2e = jax.block_until_ready(mod2(x2, training=False))
    ref2e = _ref_forward_eval(mod2, x2)
    assert jnp.allclose(out2e, ref2e, atol=1e-4, rtol=1e-4), "small-C eval mismatch"

    # --- Fallback test: force a tiny block budget to exercise the row-tiled path
    B3, C3 = 32, 256
    x3 = jax.random.normal(k_x3, (B3, C3), jnp.float32)
    mod3 = DSBN1d(C3, k_p3)
    mod3._max_block_override = 4096          # forces tc=128, tr=8 (grid (2,2,2))
    out3 = jax.block_until_ready(mod3(x3, training=True))
    ref3 = _ref_forward_train(mod3, x3)
    assert out3.shape == (B3, C3)
    assert jnp.allclose(out3, ref3, atol=1e-4, rtol=1e-4), "row-tiled train mismatch"

    print("KERNEL_OK")
</pallas_src>

<mosaic_0001>
module attributes {stable_mosaic.version = 11 : i64} {
  func.func @_train_bn_kernel(%arg0: i32, %arg1: i32, %arg2: memref<1x4x256xf32, #tpu.memory_space<vmem>>, %arg3: memref<1x1x256xf32, #tpu.memory_space<vmem>>, %arg4: memref<1x1x256xf32, #tpu.memory_space<vmem>>, %arg5: memref<1x4x256xf32, #tpu.memory_space<vmem>>, %arg6: memref<1x1x256xf32, #tpu.memory_space<vmem>>, %arg7: memref<1x1x256xf32, #tpu.memory_space<vmem>>) attributes {dimension_semantics = [#tpu.dimension_semantics<parallel>, #tpu.dimension_semantics<parallel>], iteration_bounds = array<i64: 2, 1>, scalar_prefetch = 0 : i64, scratch_operands = 0 : i64, tpu.core_type = #tpu.core_type<tc>, window_params = [{transform_indices = @transform_0, window_bounds = array<i64: 1, 4, 256>}, {transform_indices = @transform_1, window_bounds = array<i64: 1, 1, 256>}, {transform_indices = @transform_2, window_bounds = array<i64: 1, 1, 256>}, {transform_indices = @transform_3, window_bounds = array<i64: 1, 4, 256>}, {transform_indices = @transform_4, window_bounds = array<i64: 1, 1, 256>}, {transform_indices = @transform_5, window_bounds = array<i64: 1, 1, 256>}]} {
    %c0 = arith.constant 0 : index
    %c0_0 = arith.constant 0 : index
    %c0_1 = arith.constant 0 : index
    %0 = vector.load %arg2[%c0, %c0_0, %c0_1] : memref<1x4x256xf32, #tpu.memory_space<vmem>>, vector<1x4x256xf32>
    %1 = vector.shape_cast %0 : vector<1x4x256xf32> to vector<4x256xf32>
    %cst = arith.constant dense<0.000000e+00> : vector<256xf32>
    %2 = vector.multi_reduction <add>, %1, %cst [0] : vector<4x256xf32> to vector<256xf32>
    %3 = vector.shape_cast %2 : vector<256xf32> to vector<1x256xf32>
    %cst_2 = arith.constant 2.500000e-01 : f32
    %4 = vector.broadcast %cst_2 : f32 to vector<1x256xf32>
    %5 = arith.mulf %3, %4 : vector<1x256xf32>
    %6 = vector.broadcast %5 : vector<1x256xf32> to vector<4x256xf32>
    %7 = arith.subf %1, %6 : vector<4x256xf32>
    %8 = arith.mulf %7, %7 : vector<4x256xf32>
    %cst_3 = arith.constant dense<0.000000e+00> : vector<256xf32>
    %9 = vector.multi_reduction <add>, %8, %cst_3 [0] : vector<4x256xf32> to vector<256xf32>
    %10 = vector.shape_cast %9 : vector<256xf32> to vector<1x256xf32>
    %cst_4 = arith.constant 2.500000e-01 : f32
    %11 = vector.broadcast %cst_4 : f32 to vector<1x256xf32>
    %12 = arith.mulf %10, %11 : vector<1x256xf32>
    %cst_5 = arith.constant 9.99999974E-6 : f32
    %13 = vector.broadcast %cst_5 : f32 to vector<1x256xf32>
    %14 = arith.addf %12, %13 : vector<1x256xf32>
    %15 = math.rsqrt %14 : vector<1x256xf32>
    %c0_6 = arith.constant 0 : index
    %c0_7 = arith.constant 0 : index
    %c0_8 = arith.constant 0 : index
    %16 = vector.load %arg3[%c0_6, %c0_7, %c0_8] : memref<1x1x256xf32, #tpu.memory_space<vmem>>, vector<1x1x256xf32>
    %17 = vector.shape_cast %16 : vector<1x1x256xf32> to vector<1x256xf32>
    %18 = arith.mulf %15, %17 : vector<1x256xf32>
    %19 = vector.broadcast %18 : vector<1x256xf32> to vector<4x256xf32>
    %20 = arith.mulf %7, %19 : vector<4x256xf32>
    %c0_9 = arith.constant 0 : index
    %c0_10 = arith.constant 0 : index
    %c0_11 = arith.constant 0 : index
    %21 = vector.load %arg4[%c0_9, %c0_10, %c0_11] : memref<1x1x256xf32, #tpu.memory_space<vmem>>, vector<1x1x256xf32>
    %22 = vector.shape_cast %21 : vector<1x1x256xf32> to vector<1x256xf32>
    %23 = vector.broadcast %22 : vector<1x256xf32> to vector<4x256xf32>
    %24 = arith.addf %20, %23 : vector<4x256xf32>
    %c0_12 = arith.constant 0 : index
    %c0_13 = arith.constant 0 : index
    %c0_14 = arith.constant 0 : index
    %25 = vector.load %arg5[%c0_12, %c0_13, %c0_14] : memref<1x4x256xf32, #tpu.memory_space<vmem>>, vector<1x4x256xf32>
    %26 = vector.shape_cast %25 : vector<1x4x256xf32> to vector<4x256xf32>
    %27 = vector.shape_cast %24 : vector<4x256xf32> to vector<1x4x256xf32>
    tpu.vector_store %arg5[%c0_12, %c0_13, %c0_14], %27 {strides = array<i32>} : memref<1x4x256xf32, #tpu.memory_space<vmem>>, vector<1x4x256xf32>,
    %c0_15 = arith.constant 0 : index
    %c0_16 = arith.constant 0 : index
    %c0_17 = arith.constant 0 : index
    %28 = vector.load %arg6[%c0_15, %c0_16, %c0_17] : memref<1x1x256xf32, #tpu.memory_space<vmem>>, vector<1x1x256xf32>
    %29 = vector.shape_cast %28 : vector<1x1x256xf32> to vector<1x256xf32>
    %30 = vector.shape_cast %5 : vector<1x256xf32> to vector<1x1x256xf32>
    tpu.vector_store %arg6[%c0_15, %c0_16, %c0_17], %30 {strides = array<i32>} : memref<1x1x256xf32, #tpu.memory_space<vmem>>, vector<1x1x256xf32>,
    %c0_18 = arith.constant 0 : index
    %c0_19 = arith.constant 0 : index
    %c0_20 = arith.constant 0 : index
    %31 = vector.load %arg7[%c0_18, %c0_19, %c0_20] : memref<1x1x256xf32, #tpu.memory_space<vmem>>, vector<1x1x256xf32>
    %32 = vector.shape_cast %31 : vector<1x1x256xf32> to vector<1x256xf32>
    %33 = vector.shape_cast %12 : vector<1x256xf32> to vector<1x1x256xf32>
    tpu.vector_store %arg7[%c0_18, %c0_19, %c0_20], %33 {strides = array<i32>} : memref<1x1x256xf32, #tpu.memory_space<vmem>>, vector<1x1x256xf32>,
    return
  }
  func.func @transform_0(%arg0: i32, %arg1: i32) -> (i32, i32, i32) {
    %c0_i32 = arith.constant 0 : i32
    %c0_i32_0 = arith.constant 0 : i32
    return %arg0, %c0_i32, %arg1 : i32, i32, i32
  }
  func.func @transform_1(%arg0: i32, %arg1: i32) -> (i32, i32, i32) {
    %c0_i32 = arith.constant 0 : i32
    %c0_i32_0 = arith.constant 0 : i32
    return %arg0, %c0_i32, %arg1 : i32, i32, i32
  }
  func.func @transform_2(%arg0: i32, %arg1: i32) -> (i32, i32, i32) {
    %c0_i32 = arith.constant 0 : i32
    %c0_i32_0 = arith.constant 0 : i32
    return %arg0, %c0_i32, %arg1 : i32, i32, i32
  }
  func.func @transform_3(%arg0: i32, %arg1: i32) -> (i32, i32, i32) {
    %c0_i32 = arith.constant 0 : i32
    %c0_i32_0 = arith.constant 0 : i32
    return %arg0, %c0_i32, %arg1 : i32, i32, i32
  }
  func.func @transform_4(%arg0: i32, %arg1: i32) -> (i32, i32, i32) {
    %c0_i32 = arith.constant 0 : i32
    %c0_i32_0 = arith.constant 0 : i32
    return %arg0, %c0_i32, %arg1 : i32, i32, i32
  }
  func.func @transform_5(%arg0: i32, %arg1: i32) -> (i32, i32, i32) {
    %c0_i32 = arith.constant 0 : i32
    %c0_i32_0 = arith.constant 0 : i32
    return %arg0, %c0_i32, %arg1 : i32, i32, i32
  }
}

</mosaic_0001>

<bundles_post_ra>
// kernel: tpu_custom_call.1
= control target key start
LH: loop header
LB: loop body
LE: loop exit
PB: predicated region body
PF: predicated region fallthrough
CT: control target
= control target key end

     0   :  { %s1445_s0 = inlined_call_operand.hbm [shape: f32[2,4,256], index: 0, kind: input, shape index: {}]   ;;  %s1446_s1 = inlined_call_operand.hbm [shape: f32[2,1,256], index: 1, kind: input, shape index: {}]   ;;  %s1447_s2 = inlined_call_operand.hbm [shape: f32[2,1,256], index: 2, kind: input, shape index: {}]   ;;  %s1448_s3 = inlined_call_operand.hbm [shape: f32[2,4,256], index: 3, kind: output, shape index: {0}]   ;;  %s1449_s4 = inlined_call_operand.hbm [shape: f32[2,1,256], index: 4, kind: output, shape index: {1}]   ;;  %s1450_s5 = inlined_call_operand.hbm [shape: f32[2,1,256], index: 5, kind: output, shape index: {2}]  }
   0x1   :  { %1455 = sst [smem:[#allocation20_spill]] %s1446_s1 }
   0x2   :  { %1456 = sst [smem:[#allocation21_spill]] %s1447_s2 }
   0x3   :  { %11 = vsyncpa [#allocation3], 0 }
   0x4   :  { %13 = vsyncpa [#allocation3 + $0x1], 0 }
   0x5   :  { %14 = vsyncpa [#allocation6], 0 }
   0x6   :  { %16 = vsyncpa [#allocation6 + $0x1], 0 }
   0x7   :  { %17 = vsyncpa [#allocation4], 0 }
   0x8   :  { %19 = vsyncpa [#allocation4 + $0x1], 0 }
   0x9   :  { %20 = vsyncpa [#allocation10], 0 }
   0xa   :  { %22 = vsyncpa [#allocation10 + $0x1], 0  ;;  %s1145_s18 = smov 0   ;;  %s1147_s19 = smov 0  }
   0xb   :  { %s1149_s20 = smov 0   ;;  %s1151_s21 = smov 0  }
   0xc   :  { %s1153_s22 = smov 0   ;;  %s1155_s23 = smov 0  }
   0xd LB: > { %1457 = sst [smem:[#allocation16_spill]] %s1094_s20  ;;  %s1176_s24 = sadd.s32 4294967295, %s1106_s23   ;;  %s1106_s23 = sphi %s1155_s23, %s28_s23   ;;  %s1102_s22 = sphi %s1153_s22, %s1476_s22   ;;  %s1098_s21 = sphi %s1151_s21, %s1475_s21   ;;  %s1094_s20 = sphi %s1149_s20, %s1474_s20   ;;  %s1090_s19 = sphi %s1147_s19, %s1478_s19   ;;  %s1086_s18 = sphi %s1145_s18, %s1477_s18  }
   0xe   : > { %1458 = sst [smem:[#allocation17_spill]] %s1102_s22  ;;  %s1451_s25 = sadd.s32 4294967294, %s1106_s23  }
   0xf   : > { %s40_s26 = sadd.s32 1, %s1102_s22  ;;  %s49_s27 = sadd.s32 1, %s1094_s20 }
  0x10   : > { %p42_p0 = scmp.ge.s32.totalorder %s40_s26, 2  ;;  %p56_p1 = scmp.ne.s32.totalorder %s1094_s20, %s1090_s19 }
  0x11   : > { %p57_p2 = scmp.eq.s32.totalorder %s1106_s23, 0  ;;  %p62_p3 = scmp.ne.s32.totalorder %s1090_s19, %s1086_s18 }
  0x12   : > { %s1480_s26 = smov (%p42_p0, %s40_s26), 0  ;;  %p63_p5 = scmp.eq.s32.totalorder %s1176_s24, 0 }
  0x13   : > { %1459 = sst [smem:[#allocation18_spill]] %s1480_s26  ;;  %p1188_p4 = por %p57_p2, %p56_p1 }
  0x14   : > { %s44_s29 = ssub.s32 %s1102_s22, %s1480_s26  ;;  %p144_p6 = scmp.eq.s32.totalorder %s1176_s24, 1 }
  0x15   : > { %p47_p7 = scmp.eq.s32.totalorder %s44_s29, 0  ;;  %p1196_p8 = por %p63_p5, %p62_p3 }
  0x16   : > { %p1200_p9 = por %p144_p6, %p56_p1  ;;  %p150_p10 = scmp.eq.s32.totalorder %s1451_s25, 1 }
  0x17   : > { %s1207_s7 = scalar_select %p47_p7, %s1094_s20, %s49_s27  }
  0x18   : > { %p1209_p11 = por %p150_p10, %p62_p3  ;;  %p826_p13 = scmp.lt.s32.totalorder %s1106_s23, 2 }
  0x19   : > { %1463 = sst [smem:[#allocation19_spill]] %s1207_s7  ;;  %s1216_s9 = sand.u32 1, %s1094_s20  }
  0x1a   : > { %s247_s10 = sand.u32 1, %s1106_s23   ;;  %s764_s11 = sshll.u32 %s1216_s9, 1 }
  0x1b   : > { %p1222_p0 = pnand %p826_p13, %p1188_p4  ;;  %s789_s13 = sshll.u32 %s1102_s22, 5 }
  0x1c   : > { %s1466_s1 = sld [smem:[#allocation20_spill]]  ;;  %s251_s17 = scalar_lea.vmem [#allocation5], %s764_s11 }
  0x1d   : > { %s261_s27 = sshll.u32 %s251_s17, 4  ;;  %s1467_s2 = sld [smem:[#allocation21_spill]]  ;;  %s262_s27 = int_to_ptr.vmem [resolvable:$true] %s261_s27 }
  0x1e   : > { %s1237_s28 = scalar_lea.sflag [#allocation6], %s247_s10  ;;  %p884_p1 = pneg %p1222_p0 }
  0x1f   : > { %s895_s7 = scalar_lea.vmem %s262_s27, 32  ;;  %s1108_s14 = smov [#allocation5]  }
  0x20   : > { %p896_p2 = scmp.ne.s32.totalorder %s262_s27, %s895_s7  ;;  %s900_s15 = sshll.u32 %s1108_s14, 4  ;;  %s901_s15 = int_to_ptr.vmem [resolvable:$false] %s900_s15 }
  0x21   : > { %s902_s17 = scalar_lea.vmem %s901_s15, 64  ;;  %p903_p5 = scmp.lt.s32.totalorder %s262_s27, %s901_s15 }
  0x22   : > { %s259_s16 = scalar_lea.hbm %s1466_s1, %s789_s13  ;;  %p898_p3 = pnand %p896_p2, %p884_p1 }
  0x23   : > { %s1235_s26 = scalar_lea.hbm %s1467_s2, %s789_s13  ;;  %p904_p6 = scmp.lt.s32.totalorder %s902_s17, %s895_s7 }
  0x24   : > { %p899_p4 = pneg %p898_p3 }
  0x25   : > { %p905_p7 = por %p904_p6, %p903_p5 }
  0x27   : > { %p906_p10 = pnand %p905_p7, %p899_p4 }
  0x29   : > { %909 = shalt.err (!%p906_p10)
}
  0x2a   : > { %812 = dma.hbm_to_vmem [thread:$0]  (!%p1222_p0), %s259_s16, 32, %s262_s27, %s1237_s28  }
  0x2b   : > { %p770_p13 = scmp.ge.s32.totalorder %s1106_s23, 1  ;;  %p287_p2 = scmp.lt.s32.totalorder %s1106_s23, 3 }
  0x2c   : > { %s761_s7 = sshll.u32 %s1216_s9, 3  ;;  %s788_s10 = sshll.u32 %s1102_s22, 7 }
  0x2d   : > { %p1249_p3 = pnand %p770_p13, %p287_p2  ;;  %s238_s14 = scalar_lea.hbm %s1445_s0, %s788_s10 }
  0x2e   : > { %s230_s15 = scalar_lea.vmem [#allocation2], %s761_s7  ;;  %s272_s1 = scalar_lea.vmem [#allocation7], %s764_s11 }
  0x2f   : > { %s240_s17 = sshll.u32 %s230_s15, 4  ;;  %s282_s2 = sshll.u32 %s272_s1, 4  ;;  %s241_s17 = int_to_ptr.vmem [resolvable:$true] %s240_s17  ;;  %s1260_s2 = int_to_ptr.vmem [resolvable:$true] %s282_s2 }
  0x30   : > { %s227_s16 = scalar_lea.sflag [#allocation3], %s1216_s9  ;;  %s923_s27 = scalar_lea.vmem %s241_s17, 128 }
  0x31   : > { %p924_p4 = scmp.ne.s32.totalorder %s241_s17, %s923_s27  ;;  %s1109_s22 = smov [#allocation2]  }
  0x32   : > { %s928_s20 = sshll.u32 %s1109_s22, 4  ;;  %s929_s20 = int_to_ptr.vmem [resolvable:$false] %s928_s20 }
  0x33   : > { %p926_p5 = pnand %p924_p4, %p884_p1  ;;  %s930_s13 = scalar_lea.vmem %s929_s20, 256 }
  0x34   : > { %p931_p7 = scmp.lt.s32.totalorder %s241_s17, %s929_s20  ;;  %p932_p10 = scmp.lt.s32.totalorder %s930_s13, %s923_s27 }
  0x35   : > { %p927_p6 = pneg %p926_p5 }
  0x36   : > { %p933_p13 = por %p932_p10, %p931_p7 }
  0x38   : > { %p934_p2 = pnand %p933_p13, %p927_p6 }
  0x3a   : > { %937 = shalt.err (!%p934_p2)
}
  0x3b   : > { %809 = dma.hbm_to_vmem [thread:$0]  (!%p1222_p0), %s238_s14, 128, %s241_s17, %s227_s16  }
  0x3c   : > { %s951_s1 = scalar_lea.vmem %s1260_s2, 32  ;;  %s1110_s22 = smov [#allocation7]  }
  0x3d   : > { %p952_p12 = scmp.ne.s32.totalorder %s1260_s2, %s951_s1  ;;  %s956_s9 = sshll.u32 %s1110_s22, 4  ;;  %s957_s9 = int_to_ptr.vmem [resolvable:$false] %s956_s9 }
  0x3e   : > { %s958_s20 = scalar_lea.vmem %s957_s9, 64  ;;  %p959_p7 = scmp.lt.s32.totalorder %s1260_s2, %s957_s9 }
  0x3f   : > { %p954_p4 = pnand %p952_p12, %p884_p1  ;;  %p960_p6 = scmp.lt.s32.totalorder %s958_s20, %s951_s1 }
  0x41   : > { %p955_p5 = pneg %p954_p4  ;;  %p961_p10 = por %p960_p6, %p959_p7 }
  0x43   : > { %p962_p13 = pnand %p961_p10, %p955_p5 }
  0x45   : > { %965 = shalt.err (!%p962_p13)
}
  0x46   : > { %815 = dma.hbm_to_vmem [thread:$0]  (!%p1222_p0), %s1235_s26, 32, %s1260_s2, %s1237_s28  }
  0x47   : > { %291 = sbr.rel (%p1249_p3) target bundleno = 177 (0xb1), region = 32  ;;  %s1282_s11 = sand.u32 (!%p1249_p3), 1, %s1090_s19  }
  0x48   : > { %s771_s7 = sshll.u32 (!%p1249_p3), %s1282_s11, 3  ;;  %s294_s10 = scalar_lea.sflag (!%p1249_p3), [#allocation3], %s1282_s11 }
  0x49   : > { %s297_s29 = scalar_lea.vmem (!%p1249_p3), [#allocation2], %s771_s7 }
  0x4c   : > { %1069 = dma.done.wait (%p1196_p8), %s294_s10, 128  }
  0x4d   : > { %1071 = vsyncadd (%p1196_p8), %s294_s10, 4294967168  ;;  %s302_s2 = sand.u32 1, %s1176_s24   ;;  %s1294_s26 = sshll.u32 %s1282_s11, 1 }
  0x4e   : > { %s303_s12 = scalar_lea.sflag [#allocation6], %s302_s2  ;;  %s306_s28 = scalar_lea.vmem [#allocation5], %s1294_s26 }
  0x4f   : > { %1073 = dma.done.wait (%p1196_p8), %s303_s12, 64  }
  0x50   : > { %1075 = vsyncadd (%p1196_p8), %s303_s12, 4294967232  ;;  %vm372_vm0 = vcmask 1043456   ;;  %v368_v0 = vld [vmem:[%s297_s29] sm:$0xff]  ;;  %v1111_v11 = vmov 1966171168   ;;  %v420_v15 = vlaneseq  ;;  %s354_s30 = scalar_lea.vmem [#allocation9], %s1294_s26 }
  0x51   : > { %v370_v1 = vcombine.high %v368_v0, %v368_v0  ;;  %v373_v2 = vsel %vm372_vm0, %v368_v0, 0.0  ;;  %v460_v12 = vunpack.c.l.s4 %v1111_v11  ;;  %s541_s25 = sshll.u32 %s354_s30, 4  ;;  %s792_s14 = sshll.u32 %s1098_s21, 5  ;;  %s1319_s25 = int_to_ptr.vmem [resolvable:$true] %s541_s25 }
  0x52   : > { %v374_v3 = vrot.slane %v373_v2, 4  ;;  %v1305_v21 = vshrl.u32 %v420_v15, 7  ;;  %vm1315_vm1 = vcmp.lt.s32.totalorder %v420_v15, 256  ;;  %s1329_s16 = scalar_lea.hbm %s1449_s4, %s792_s14  ;;  %s1336_s27 = scalar_lea.sflag [#allocation10], %s302_s2 }
  0x53   : > { %v380_v4 = vsel %vm372_vm0, %v370_v1, 0.0  ;;  %v461_v18 = vunpack.c.0.s8 %v460_v12  ;;  %s966_s13 = scalar_lea.vmem %s1319_s25, 32  ;;  %s1112_s1 = smov [#allocation9]  }
  0x54   : > { %v375_v5 = vadd.f32 %v374_v3, %v373_v2  ;;  %v381_v6 = vrot.slane %v380_v4, 4  ;;  %p967_p8 = scmp.ne.s32.totalorder %s1319_s25, %s966_s13  ;;  %s970_s22 = sshll.u32 %s1112_s1, 4  ;;  %s971_s22 = int_to_ptr.vmem [resolvable:$false] %s970_s22 }
  0x55   : > { %v1308_v23 = vsub.s32 %v461_v18, %v1305_v21  ;;  %s972_s9 = scalar_lea.vmem %s971_s22, 64  ;;  %p973_p1 = scmp.lt.s32.totalorder %s1319_s25, %s971_s22 }
  0x56   : > { %v376_v7 = vrot.slane %v375_v5, 2  ;;  %v382_v8 = vadd.f32 %v381_v6, %v380_v4  ;;  %p968_p12 = pnand %p967_p8, %p1200_p9  ;;  %p974_p3 = scmp.lt.s32.totalorder %s972_s9, %s966_s13 }
  0x58   : > { %v377_v9 = vadd.f32 %v376_v7, %v375_v5  ;;  %v383_v10 = vrot.slane %v382_v8, 2  ;;  %p969_p0 = pneg %p968_p12  ;;  %p975_p2 = por %p974_p3, %p973_p1 }
  0x5a   : > { %v378_v13 = vrot.slane %v377_v9, 1  ;;  %v384_v14 = vadd.f32 %v383_v10, %v382_v8  ;;  %p976_p4 = pnand %p975_p2, %p969_p0 }
  0x5c   : > { %v379_v16 = vadd.f32 %v378_v13, %v377_v9  ;;  %v385_v17 = vrot.slane %v384_v14, 1 }
  0x5e   : > { %v386_v19 = vadd.f32 %v385_v17, %v384_v14  ;;  %v387_v20 = vmul.f32 0.25, %v379_v16 }
  0x60   : > { %v388_v22 = vmul.f32 0.25, %v386_v19 }
  0x62   : > { %v391_v24 = vcombine.low %v387_v20, %v388_v22 }
  0x64   : > { %v465_v25 = vrot.slane %v391_v24, %v1308_v23  ;;  %v1313_v26 = vsub.f32 %v368_v0, %v391_v24 }
  0x66   : > { %v472_v28 = vrot.slane %v465_v25, %v1308_v23  ;;  %v394_v29 = vmul.f32 %v1313_v26, %v1313_v26 }
  0x68   : > { %478 = vst.msk [vmem:[%s354_s30] sm:$0x3] %vm1315_vm1, %v472_v28  ;;  %v396_v30 = vcombine.high %v394_v29, %v394_v29  ;;  %v398_v31 = vsel %vm372_vm0, %v394_v29, 0.0 }
  0x69   : > { %v399_v32 = vrot.slane %v398_v31, 4 }
  0x6a   : > { %979 = shalt.err (!%p976_p4)
}
  0x6b   : > { %s980_s24 = scalar_lea.hbm %s1329_s16, 32  ;;  %s984_s29 = scalar_lea.hbm %s1449_s4, 64 }
  0x6c   : > { %p981_p5 = scmp.ne.s32.totalorder %s1329_s16, %s980_s24  ;;  %p985_p10 = scmp.lt.s32.totalorder %s1329_s16, %s1449_s4 }
  0x6d   : > { %p986_p13 = scmp.lt.s32.totalorder %s984_s29, %s980_s24 }
  0x6e   : > { %p982_p7 = pnand %p981_p5, %p1200_p9 }
  0x6f   : > { %p987_p8 = por %p986_p13, %p985_p10 }
  0x70   : > { %p983_p6 = pneg %p982_p7 }
  0x72   : > { %p988_p12 = pnand %p987_p8, %p983_p6 }
  0x74   : > { %991 = shalt.err (!%p988_p12)
}
  0x75   : > { %801 = dma.vmem_to_hbm [thread:$0]  (%p1200_p9), %s1319_s25, 32, %s1329_s16, %s1336_s27   ;;  %v405_v33 = vsel %vm372_vm0, %v396_v30, 0.0  ;;  %v400_v34 = vadd.f32 %v399_v32, %v398_v31  ;;  %v422_v52 = vsub.s32 0, %v1305_v21  ;;  %v418_v53 = vld [vmem:[%s306_s28] sm:$0x3] }
  0x76   : > { %v406_v35 = vrot.slane %v405_v33, 4  ;;  %s361_s30 = scalar_lea.vmem [#allocation11], %s1294_s26  ;;  %s555_s16 = scalar_lea.hbm %s1450_s5, %s792_s14 }
  0x77   : > { %v401_v36 = vrot.slane %v400_v34, 2  ;;  %s557_s25 = sshll.u32 %s361_s30, 4  ;;  %s1113_s1 = smov [#allocation11]   ;;  %s1363_s25 = int_to_ptr.vmem [resolvable:$true] %s557_s25 }
  0x78   : > { %v407_v37 = vadd.f32 %v406_v35, %v405_v33  ;;  %s992_s13 = scalar_lea.vmem %s1363_s25, 32  ;;  %s996_s22 = sshll.u32 %s1113_s1, 4  ;;  %s997_s22 = int_to_ptr.vmem [resolvable:$false] %s996_s22 }
  0x79   : > { %v402_v38 = vadd.f32 %v401_v36, %v400_v34  ;;  %p993_p0 = scmp.ne.s32.totalorder %s1363_s25, %s992_s13  ;;  %s998_s9 = scalar_lea.vmem %s997_s22, 64 }
  0x7a   : > { %v408_v39 = vrot.slane %v407_v37, 2  ;;  %p999_p2 = scmp.lt.s32.totalorder %s1363_s25, %s997_s22  ;;  %p1000_p4 = scmp.lt.s32.totalorder %s998_s9, %s992_s13 }
  0x7b   : > { %v403_v40 = vrot.slane %v402_v38, 1  ;;  %p994_p1 = pnand %p993_p0, %p1200_p9 }
  0x7c   : > { %v409_v41 = vadd.f32 %v408_v39, %v407_v37  ;;  %p1001_p5 = por %p1000_p4, %p999_p2 }
  0x7d   : > { %v404_v42 = vadd.f32 %v403_v40, %v402_v38  ;;  %p995_p3 = pneg %p994_p1 }
  0x7e   : > { %v410_v43 = vrot.slane %v409_v41, 1 }
  0x7f   : > { %v412_v45 = vmul.f32 0.25, %v404_v42  ;;  %p1002_p7 = pnand %p1001_p5, %p995_p3 }
  0x80   : > { %v411_v44 = vadd.f32 %v410_v43, %v409_v41 }
  0x81   : > { %v414_v47 = vadd.f32 1e-05, %v412_v45 }
  0x82   : > { %v413_v46 = vmul.f32 0.25, %v411_v44 }
  0x83   : > { %878 = vrsqrt.f32 %v414_v47 }
  0x84   : > { %v415_v48 = vadd.f32 1e-05, %v413_v46  ;;  %v481_v49 = vcombine.low %v412_v45, %v413_v46 }
  0x86   : > { %880 = vrsqrt.f32 %v415_v48  ;;  %v488_v50 = vrot.slane %v481_v49, %v1308_v23 }
  0x88   : > { %v495_v51 = vrot.slane %v488_v50, %v1308_v23 }
  0x8a   : > { %497 = vst.msk [vmem:[%s361_s30] sm:$0x3] %vm1315_vm1, %v495_v51 }
  0x8b   : > { %1005 = shalt.err (!%p1002_p7)
}
  0x8c   : > { %s1006_s14 = scalar_lea.hbm %s555_s16, 32  ;;  %s1010_s20 = scalar_lea.hbm %s1450_s5, 64 }
  0x8d   : > { %p1007_p6 = scmp.ne.s32.totalorder %s555_s16, %s1006_s14  ;;  %p1011_p8 = scmp.lt.s32.totalorder %s555_s16, %s1450_s5 }
  0x8e   : > { %p1012_p12 = scmp.lt.s32.totalorder %s1010_s20, %s1006_s14 }
  0x8f   : > { %p1008_p10 = pnand %p1007_p6, %p1200_p9 }
  0x90   : > { %p1013_p0 = por %p1012_p12, %p1011_p8 }
  0x91   : > { %p1009_p13 = pneg %p1008_p10 }
  0x93   : > { %p1014_p1 = pnand %p1013_p0, %p1009_p13 }
  0x95   : > { %1017 = shalt.err (!%p1014_p1)
}
  0x96   : > { %802 = dma.vmem_to_hbm [thread:$0]  (%p1200_p9), %s1363_s25, 32, %s555_s16, %s1336_s27   ;;  %v426_v54 = vsub.s32 1, %v1305_v21  ;;  %v423_v55 = vrot.slane %v418_v53, %v422_v52  ;;  %v879_v57 = vpop.eup %878 }
  0x97   : > { %s315_s2 = scalar_lea.vmem [#allocation7], %s1294_s26  ;;  %v881_v60 = vpop.eup %880  ;;  %s347_s27 = scalar_lea.vmem [#allocation8], %s771_s7 }
  0x98   : > { %v427_v56 = vrot.slane %v418_v53, %v426_v54  ;;  %v445_v58 = vld [vmem:[%s315_s2] sm:$0x3]  ;;  %v430_v59 = vmul.f32 %v879_v57, %v423_v55  ;;  %s525_s12 = sshll.u32 %s347_s27, 4  ;;  %s791_s30 = sshll.u32 %s1098_s21, 7  ;;  %s1398_s12 = int_to_ptr.vmem [resolvable:$true] %s525_s12 }
  0x99   : > { %v450_v63 = vrot.slane %v445_v58, %v422_v52  ;;  %v454_v0 = vrot.slane %v445_v58, %v426_v54  ;;  %s523_s15 = scalar_lea.hbm %s1448_s3, %s791_s30  ;;  %s499_s17 = scalar_lea.sflag [#allocation4], %s1282_s11 }
  0x9a   : > { %v431_v61 = vmul.f32 %v881_v60, %v427_v56  ;;  %v435_v62 = vrot.slane %v430_v59, %v422_v52  ;;  %s1018_s16 = scalar_lea.vmem %s1398_s12, 128  ;;  %s1114_s21 = smov [#allocation8]  }
  0x9b   : > { %v455_v3 = vcombine.low %v450_v63, %v454_v0  ;;  %p1019_p3 = scmp.ne.s32.totalorder %s1398_s12, %s1018_s16  ;;  %s1022_s7 = sshll.u32 %s1114_s21, 4  ;;  %s1023_s7 = int_to_ptr.vmem [resolvable:$false] %s1022_s7 }
  0x9c   : > { %v439_v1 = vrot.slane %v431_v61, %v422_v52  ;;  %s1024_s13 = scalar_lea.vmem %s1023_s7, 256  ;;  %p1025_p5 = scmp.lt.s32.totalorder %s1398_s12, %s1023_s7 }
  0x9d   : > { %p1020_p2 = pnand %p1019_p3, %p1200_p9  ;;  %p1026_p7 = scmp.lt.s32.totalorder %s1024_s13, %s1018_s16 }
  0x9e   : > { %v442_v2 = vcombine.low %v435_v62, %v439_v1 }
  0x9f   : > { %p1021_p4 = pneg %p1020_p2  ;;  %p1027_p6 = por %p1026_p7, %p1025_p5 }
  0xa0   : > { %v444_v4 = vmul.f32 %v442_v2, %v1313_v26 }
  0xa1   : > { %p1028_p10 = pnand %p1027_p6, %p1021_p4 }
  0xa2   : > { %v457_v5 = vadd.f32 %v455_v3, %v444_v4 }
  0xa4   : > { %458 = vst [vmem:[%s347_s27] sm:$0xff] %v457_v5 }
  0xa5   : > { %1031 = shalt.err (!%p1028_p10)
}
  0xa6   : > { %s1032_s1 = scalar_lea.hbm %s523_s15, 128  ;;  %s1036_s9 = scalar_lea.hbm %s1448_s3, 256 }
  0xa7   : > { %p1033_p13 = scmp.ne.s32.totalorder %s523_s15, %s1032_s1  ;;  %p1037_p0 = scmp.lt.s32.totalorder %s523_s15, %s1448_s3 }
  0xa8   : > { %p1038_p1 = scmp.lt.s32.totalorder %s1036_s9, %s1032_s1 }
  0xa9   : > { %p1034_p8 = pnand %p1033_p13, %p1200_p9 }
  0xaa   : > { %p1039_p3 = por %p1038_p1, %p1037_p0 }
  0xab   : > { %p1035_p12 = pneg %p1034_p8 }
  0xad   : > { %p1040_p2 = pnand %p1039_p3, %p1035_p12 }
  0xaf   : > { %1043 = shalt.err (!%p1040_p2)
}
  0xb0   : > { %800 = dma.vmem_to_hbm [thread:$0]  (%p1200_p9), %s1398_s12, 128, %s523_s15, %s499_s17  }
  0xb1 PF: > { %s569_s24 = sand.u32 1, %s1086_s18   ;;  %p1471_p4 = scmp.ge.s32.totalorder %s1106_s23, 2 }
  0xb2   : > { %s570_s20 = scalar_lea.sflag [#allocation4], %s569_s24 }
  0xb3   : > { %p817_p5 = pnand %p1471_p4, %p1209_p11 }
  0xb5   : > { %p818_p7 = pneg %p817_p5 }
  0xb7   : > { %1077 = dma.done.wait (%p818_p7), %s570_s20, 128  }
  0xb8   : > { %1079 = vsyncadd (%p818_p7), %s570_s20, 4294967168  ;;  %s1472_s10 = sadd.s32 4294967294, %s1106_s23  }
  0xb9   : > { %s578_s29 = sand.u32 1, %s1472_s10  }
  0xba   : > { %s579_s2 = scalar_lea.sflag [#allocation10], %s578_s29 }
  0xbb   : > { %1081 = dma.done.wait (%p818_p7), %s579_s2, 64  }
  0xbc   : > { %1083 = vsyncadd (%p818_p7), %s579_s2, 4294967232  ;;  %s28_s23 = sadd.s32 1, %s1106_s23   ;;  %s1473_s6 = sld [smem:[#allocation16_spill]] }
  0xbd   : > { %p25_p9 = scmp.ge.s32.totalorder %s28_s23, 4   ;;  %s1474_s20 = sld [smem:[#allocation19_spill]] }
  0xbe   : > { %s1475_s21 = sld [smem:[#allocation17_spill]]  ;;  %s1477_s18 = smov %s1090_s19 }
  0xbf   : > { %s1476_s22 = sld [smem:[#allocation18_spill]]  ;;  %27 = sbr.rel (!%p25_p9) target bundleno = 13 (0xd), region = 133 }
  0xc2   : > { %s1478_s19 = smov %s1473_s6 }
  0xc4   :  { %593 = vsyncpa [#allocation3], 1 }
  0xc5   :  { %595 = vsyncpa [#allocation3 + $0x1], 1 }
  0xc6   :  { %596 = vsyncpa [#allocation6], 1 }
  0xc7   :  { %598 = vsyncpa [#allocation6 + $0x1], 1 }
  0xc8   :  { %599 = vsyncpa [#allocation4], 1 }
  0xc9   :  { %601 = vsyncpa [#allocation4 + $0x1], 1 }
  0xca   :  { %602 = vsyncpa [#allocation10], 1 }
  0xcb   :  { %604 = vsyncpa [#allocation10 + $0x1], 1 }

</bundles_post_ra>
